<compile_context>
chip_gen: v7x
topology: tpu7x:2x2x1
jax: 0.10.0
libtpu: 0.0.40
codegen_flags: <defaults>
</compile_context>

<pallas_src>
import functools

import jax
import jax.numpy as jnp
from jax.experimental import pallas as pl
from jax.experimental.pallas import tpu as pltpu

LANE = 128
SUBLANE_I8 = 32  # native int8 sublane tile; keep row counts multiples of this


def _round_down(x, m):
    return (x // m) * m


def _lowbias32(x):
    """High-avalanche 32-bit integer hash (Chris Wellons' lowbias32)."""
    x = x ^ (x >> jnp.uint32(16))
    x = x * jnp.uint32(0x7FEB352D)
    x = x ^ (x >> jnp.uint32(15))
    x = x * jnp.uint32(0x846CA68B)
    x = x ^ (x >> jnp.uint32(16))
    return x


def _sparse_dropout_kernel(seed_ref, vals_ref, out_vals_ref, mask_ref, *,
                           keep_threshold, scale):
    r, c = vals_ref.shape  # (tile_r, 128) static block shape

    # Scalar-side seed whitening (scalar unit; negligible cost per block).
    stream = _lowbias32(seed_ref[0].astype(jnp.uint32) ^ jnp.uint32(0x9E3779B9))

    # Global element id, fused: block_base + row*128 + lane.  Unique per
    # element across the whole grid, so the random stream is independent of
    # tiling / TensorCore assignment.  int32 iotas (known-good on Mosaic);
    # the int32 -> uint32 astype is a free bitcast.
    base = pl.program_id(0).astype(jnp.uint32) * jnp.uint32(r * c)
    gid = (jax.lax.broadcasted_iota(jnp.int32, (r, c), 0) * c
           + jax.lax.broadcasted_iota(jnp.int32, (r, c), 1)).astype(jnp.uint32)

    # Single lowbias32 round; keep with probability kprob via a full 32-bit
    # unsigned threshold compare.
    bits = _lowbias32((gid + base) ^ stream)
    keep = bits < jnp.uint32(keep_threshold)

    out_vals_ref[...] = jnp.where(keep,
                                  vals_ref[...] * jnp.float32(scale),
                                  jnp.float32(0.0))
    mask_ref[...] = keep.astype(jnp.int8)


def sparse_dropout(indices, values, dprob, seed, training=True, tile_rows=2048):
    """indices: (2, nnz) int32, values: (nnz,) float32.

    Returns (indices, new_values, keep_mask).  Dropped entries have value 0
    (dense-equivalent of PyTorch's index filtering); keep_mask is int8.
    """
    if not training:
        return indices, values, jnp.ones(values.shape, dtype=jnp.int8)

    kprob = 1.0 - float(dprob)
    nnz = values.shape[0]

    # Edge cases: empty tensor, or drop-everything (avoid 1/0 scale).
    if nnz == 0:
        return indices, values.astype(jnp.float32), jnp.zeros((0,), jnp.int8)
    if kprob <= 0.0:
        return (indices, jnp.zeros((nnz,), jnp.float32),
                jnp.zeros((nnz,), jnp.int8))

    # Row layout: ceil(nnz/128) rows, rounded up to a multiple of 32 so both
    # the f32 (8,128) and int8 (32,128) native tilings are respected.
    rows = pl.cdiv(nnz, LANE)
    rows = pl.cdiv(rows, SUBLANE_I8) * SUBLANE_I8

    # Tile: big (amortize ~0.35us/step grid overhead), multiple of 32, and
    # capped so the grid has >= 2 blocks when possible (v7x: two TensorCores
    # share the "parallel" axis).
    req = max(SUBLANE_I8, _round_down(int(tile_rows), SUBLANE_I8))
    tile_r = min(req, max(SUBLANE_I8, _round_down(rows // 2, SUBLANE_I8)))
    tile_r = min(tile_r, rows)
    grid = pl.cdiv(rows, tile_r)

    pad = rows * LANE - nnz
    vals2d = jnp.pad(values.astype(jnp.float32), (0, pad)).reshape(rows, LANE)

    # keep iff hash < round(kprob * 2^32); clamped to 2^32-1 when kprob == 1.0
    # (adds a vanishing 2^-32 extra drop probability).
    keep_threshold = min(int(round(kprob * 4294967296.0)), 4294967295)
    kernel = functools.partial(
        _sparse_dropout_kernel,
        keep_threshold=keep_threshold,
        scale=1.0 / kprob,
    )

    n_elems = rows * LANE
    out2d, mask2d = pl.pallas_call(
        kernel,
        grid=(grid,),
        out_shape=(
            jax.ShapeDtypeStruct((rows, LANE), jnp.float32),
            jax.ShapeDtypeStruct((rows, LANE), jnp.int8),
        ),
        in_specs=[
            pl.BlockSpec(memory_space=pltpu.MemorySpace.SMEM),  # seed scalar
            pl.BlockSpec((tile_r, LANE), lambda i: (i, 0)),     # values tile
        ],
        out_specs=(
            pl.BlockSpec((tile_r, LANE), lambda i: (i, 0)),
            pl.BlockSpec((tile_r, LANE), lambda i: (i, 0)),
        ),
        # Reuse the padded values buffer as the f32 output buffer.
        input_output_aliases={1: 0},
        compiler_params=pltpu.CompilerParams(
            dimension_semantics=("parallel",)),
        cost_estimate=pl.CostEstimate(
            flops=2 * n_elems,
            transcendentals=0,
            bytes_accessed=n_elems * (4 + 4 + 1),
        ),
    )(jnp.array([int(seed) & 0x7FFFFFFF], dtype=jnp.int32), vals2d)

    new_values = out2d.reshape(-1)[:nnz]
    keep_mask = mask2d.reshape(-1)[:nnz]
    # TODO(synk): true index compaction (indices[:, mask]) needs dynamic output
    # shapes; done host-side if a smaller nnz is required — dense semantics are
    # already exact here.
    return indices, new_values, keep_mask


def _check_case(nnz, dprob, seed, key):
    k_idx, k_val = jax.random.split(key)
    indices = jax.random.randint(k_idx, (2, nnz), 0, 64, dtype=jnp.int32)
    values = jax.random.normal(k_val, (nnz,), dtype=jnp.float32)

    idx_out, vals_out, mask = sparse_dropout(indices, values, dprob, seed=seed,
                                             training=True)
    jax.block_until_ready((idx_out, vals_out, mask))

    kprob = 1.0 - dprob
    mask_b = mask.astype(bool)
    expected_kept = values * (1.0 / kprob)
    ok_kept = bool(jnp.allclose(jnp.where(mask_b, vals_out, 0.0),
                                jnp.where(mask_b, expected_kept, 0.0),
                                rtol=1e-6, atol=1e-6))
    ok_dropped = bool(jnp.all(jnp.where(mask_b, 0.0, vals_out) == 0.0))
    keep_frac = float(jnp.mean(mask.astype(jnp.float32)))
    ok_frac = abs(keep_frac - kprob) < 0.15  # loose statistical check

    # Eval mode is identity.
    _, vals_eval, _ = sparse_dropout(indices, values, dprob, seed=seed,
                                     training=False)
    ok_eval = bool(jnp.array_equal(vals_eval, values))
    return ok_kept, ok_dropped, ok_frac, ok_eval, keep_frac


if __name__ == "__main__":
    key = jax.random.PRNGKey(0)
    k1, k2 = jax.random.split(key)

    # Small case (single grid block) and a multi-block case (partial last
    # block, exercises OOB store masking and the parallel grid axis).
    results = []
    results.append(_check_case(nnz=1000, dprob=0.5, seed=1234, key=k1))
    results.append(_check_case(nnz=23456, dprob=0.3, seed=777, key=k2))

    all_ok = all(ok_kept and ok_dropped and ok_frac and ok_eval
                 for ok_kept, ok_dropped, ok_frac, ok_eval, _ in results)
    if all_ok:
        print("KERNEL_OK")
    else:
        raise SystemExit(f"check failed: {results}")
</pallas_src>

<mosaic_0001>
module attributes {stable_mosaic.version = 11 : i64} {
  func.func @_sparse_dropout_kernel(%arg0: i32, %arg1: memref<1xi32, #tpu.memory_space<smem>>, %arg2: memref<32x128xf32, #tpu.memory_space<vmem>>, %arg3: memref<32x128xf32, #tpu.memory_space<vmem>>, %arg4: memref<32x128xi8, #tpu.memory_space<vmem>>) attributes {dimension_semantics = [#tpu.dimension_semantics<parallel>], iteration_bounds = array<i64: 1>, scalar_prefetch = 0 : i64, scratch_operands = 0 : i64, tpu.core_type = #tpu.core_type<tc>, window_params = [{transform_indices = @transform_0, window_bounds = array<i64: 1>}, {transform_indices = @transform_1, window_bounds = array<i64: 32, 128>}, {transform_indices = @transform_2, window_bounds = array<i64: 32, 128>}, {transform_indices = @transform_3, window_bounds = array<i64: 32, 128>}]} {
    %c0 = arith.constant 0 : index
    %0 = memref.load %arg1[%c0] : memref<1xi32, #tpu.memory_space<smem>>
    %c-1640531527_i32 = arith.constant -1640531527 : i32
    %1 = arith.xori %0, %c-1640531527_i32 : i32
    %c16_i32 = arith.constant 16 : i32
    %2 = arith.shrui %1, %c16_i32 : i32
    %3 = arith.xori %1, %2 : i32
    %c2146121005_i32 = arith.constant 2146121005 : i32
    %4 = arith.muli %3, %c2146121005_i32 : i32
    %c15_i32 = arith.constant 15 : i32
    %5 = arith.shrui %4, %c15_i32 : i32
    %6 = arith.xori %4, %5 : i32
    %c-2073254261_i32 = arith.constant -2073254261 : i32
    %7 = arith.muli %6, %c-2073254261_i32 : i32
    %c16_i32_0 = arith.constant 16 : i32
    %8 = arith.shrui %7, %c16_i32_0 : i32
    %9 = arith.xori %7, %8 : i32
    %c4096_i32 = arith.constant 4096 : i32
    %10 = arith.muli %arg0, %c4096_i32 : i32
    %11 = tpu.iota {dimensions = array<i32: 0>} : vector<32x128xi32>
    %c128_i32 = arith.constant 128 : i32
    %12 = vector.broadcast %c128_i32 : i32 to vector<32x128xi32>
    %13 = arith.muli %11, %12 : vector<32x128xi32>
    %14 = tpu.iota {dimensions = array<i32: 1>} : vector<32x128xi32>
    %15 = arith.addi %13, %14 : vector<32x128xi32>
    %16 = vector.broadcast %10 : i32 to vector<32x128xi32>
    %17 = arith.addi %15, %16 : vector<32x128xi32>
    %18 = vector.broadcast %9 : i32 to vector<32x128xi32>
    %19 = arith.xori %17, %18 : vector<32x128xi32>
    %c16_i32_1 = arith.constant 16 : i32
    %20 = vector.broadcast %c16_i32_1 : i32 to vector<32x128xi32>
    %21 = arith.shrui %19, %20 : vector<32x128xi32>
    %22 = arith.xori %19, %21 : vector<32x128xi32>
    %c2146121005_i32_2 = arith.constant 2146121005 : i32
    %23 = vector.broadcast %c2146121005_i32_2 : i32 to vector<32x128xi32>
    %24 = arith.muli %22, %23 : vector<32x128xi32>
    %c15_i32_3 = arith.constant 15 : i32
    %25 = vector.broadcast %c15_i32_3 : i32 to vector<32x128xi32>
    %26 = arith.shrui %24, %25 : vector<32x128xi32>
    %27 = arith.xori %24, %26 : vector<32x128xi32>
    %c-2073254261_i32_4 = arith.constant -2073254261 : i32
    %28 = vector.broadcast %c-2073254261_i32_4 : i32 to vector<32x128xi32>
    %29 = arith.muli %27, %28 : vector<32x128xi32>
    %c16_i32_5 = arith.constant 16 : i32
    %30 = vector.broadcast %c16_i32_5 : i32 to vector<32x128xi32>
    %31 = arith.shrui %29, %30 : vector<32x128xi32>
    %32 = arith.xori %29, %31 : vector<32x128xi32>
    %c-2147483648_i32 = arith.constant -2147483648 : i32
    %33 = vector.broadcast %c-2147483648_i32 : i32 to vector<32x128xi32>
    %34 = arith.cmpi ult, %32, %33 : vector<32x128xi32>
    %c0_6 = arith.constant 0 : index
    %c0_7 = arith.constant 0 : index
    %35 = vector.load %arg2[%c0_6, %c0_7] : memref<32x128xf32, #tpu.memory_space<vmem>>, vector<32x128xf32>
    %cst = arith.constant 2.000000e+00 : f32
    %36 = vector.broadcast %cst : f32 to vector<32x128xf32>
    %37 = arith.mulf %35, %36 : vector<32x128xf32>
    %cst_8 = arith.constant 0.000000e+00 : f32
    %38 = vector.broadcast %cst_8 : f32 to vector<32x128xf32>
    %39 = arith.select %34, %37, %38 : vector<32x128xi1>, vector<32x128xf32>
    %c0_9 = arith.constant 0 : index
    %c0_10 = arith.constant 0 : index
    %40 = vector.load %arg3[%c0_9, %c0_10] : memref<32x128xf32, #tpu.memory_space<vmem>>, vector<32x128xf32>
    tpu.vector_store %arg3[%c0_9, %c0_10], %39 {strides = array<i32>} : memref<32x128xf32, #tpu.memory_space<vmem>>, vector<32x128xf32>,
    %41 = arith.extui %34 : vector<32x128xi1> to vector<32x128xi8>
    %c0_11 = arith.constant 0 : index
    %c0_12 = arith.constant 0 : index
    %42 = vector.load %arg4[%c0_11, %c0_12] : memref<32x128xi8, #tpu.memory_space<vmem>>, vector<32x128xi8>
    tpu.vector_store %arg4[%c0_11, %c0_12], %41 {strides = array<i32>} : memref<32x128xi8, #tpu.memory_space<vmem>>, vector<32x128xi8>,
    return
  }
  func.func @transform_0(%arg0: i32) -> i32 {
    %c0_i32 = arith.constant 0 : i32
    %c0_i32_0 = arith.constant 0 : i32
    return %c0_i32 : i32
  }
  func.func @transform_1(%arg0: i32) -> (i32, i32) {
    %c0_i32 = arith.constant 0 : i32
    %c0_i32_0 = arith.constant 0 : i32
    return %arg0, %c0_i32 : i32, i32
  }
  func.func @transform_2(%arg0: i32) -> (i32, i32) {
    %c0_i32 = arith.constant 0 : i32
    %c0_i32_0 = arith.constant 0 : i32
    return %arg0, %c0_i32 : i32, i32
  }
  func.func @transform_3(%arg0: i32) -> (i32, i32) {
    %c0_i32 = arith.constant 0 : i32
    %c0_i32_0 = arith.constant 0 : i32
    return %arg0, %c0_i32 : i32, i32
  }
}

</mosaic_0001>

<bundles_post_ra>
// kernel: tpu_custom_call.1
= control target key start
LH: loop header
LB: loop body
LE: loop exit
PB: predicated region body
PF: predicated region fallthrough
CT: control target
= control target key end

     0   :  { %10 = vsyncpa [#allocation4], 0  ;;  %s312_s0 = inlined_call_operand.<no memory space> [shape: s32[1], index: 0, kind: input, shape index: {}]   ;;  %s313_s1 = inlined_call_operand.hbm [shape: f32[32,128], index: 1, kind: input, shape index: {}, may-alias: {1,2}]   ;;  %s314_s2 = inlined_call_operand.hbm [shape: f32[32,128], index: 2, kind: output, shape index: {0}, may-alias: {1,2}]   ;;  %s315_s3 = inlined_call_operand.hbm [shape: s8[32,128], index: 3, kind: output, shape index: {1}]  }
   0x1   :  { %11 = vsyncpa [#allocation5], 0 }
   0x2   :  { %12 = vsyncpa [#allocation8], 0  ;;  %s234_s12 = smov [#allocation3]   ;;  %s162_s16 = scalar_lea.hbm %s313_s1, 512 }
   0x3   :  { %s20_s13 = sshll.u32 %s234_s12, 4  ;;  %p163_p0 = scmp.ne.s32.totalorder %s313_s1, %s162_s16  ;;  %s21_s13 = int_to_ptr.vmem [resolvable:$true] %s20_s13 }
   0x4   :  { %p166_p1 = scmp.lt.u32.totalorder %s162_s16, %s313_s1 }
   0x6   :  { %p168_p2 = pnand %p166_p1, %p163_p0 }
   0x8   :  { %171 = shalt.err (!%p168_p2)
}
   0x9   :  { %s172_s21 = scalar_lea.vmem %s21_s13, 512  ;;  %p177_p4 = scmp.lt.s32.totalorder %s21_s13, %s21_s13 }
   0xa   :  { %p173_p3 = scmp.ne.s32.totalorder %s21_s13, %s172_s21  ;;  %p178_p5 = scmp.lt.s32.totalorder %s172_s21, %s172_s21 }
   0xc   :  { %p179_p6 = por %p178_p5, %p177_p4 }
   0xe   :  { %p180_p7 = pnand %p179_p6, %p173_p3 }
  0x10   :  { %183 = shalt.err (!%p180_p7)
}
  0x11   :  { %s235_s22 = smov 128   ;;  %s236_s23 = smov 8  }
  0x12   :  { %26 = dma.hbm_to_vmem [thread:$0]  %s313_s1, 512, %s21_s13, [#allocation4], %s235_s22, %s235_s22, %s236_s23  }
  0x13   :  { %228 = dma.done.wait [#allocation4], 512  }
  0x14   :  { %229 = vsyncadd [#allocation4], 4294966784  ;;  %s33_s28 = sxor.u32 2654435769, %s312_s0  ;;  %v43_v0 = vlaneseq  ;;  %v104_v40 = vld [vmem:[#allocation3] sm:$0xff]  ;;  %v105_v42 = vld [vmem:[#allocation3 + $0x8] sm:$0xff] }
  0x15   :  { %s34_s29 = sshrl.u32 %s33_s28, 16  ;;  %v106_v44 = vld [vmem:[#allocation3 + $0x10] sm:$0xff]  ;;  %v107_v46 = vld [vmem:[#allocation3 + $0x18] sm:$0xff]  ;;  %v108_v49 = vmul.f32 2.0, %v104_v40  ;;  %v109_v50 = vmul.f32 2.0, %v105_v42  ;;  %s237_s8 = smov [#allocation6]  }
  0x16   :  { %s35_s30 = sxor.u32 %s34_s29, %s33_s28  ;;  %v44_v1 = vshrl.u32 %v43_v0, 7  ;;  %v53_v2 = vand.u32 127, %v43_v0  ;;  %v110_v55 = vmul.f32 2.0, %v106_v44  ;;  %v111_v56 = vmul.f32 2.0, %v107_v46  ;;  %s130_s9 = sshll.u32 %s237_s8, 4  ;;  %s131_s9 = int_to_ptr.vmem [resolvable:$true] %s130_s9 }
  0x17   :  { %s36_s4 = smul.u32 2146121005, %s35_s30  ;;  %s238_s10 = smov [#allocation7]   ;;  %v239_v63 = vmov 0  }
  0x18   :  { %v48_v3 = vmul.u32 128, %v44_v1  ;;  %v45_v4 = vadd.s32 8, %v44_v1  ;;  %v46_v5 = vadd.s32 16, %v44_v1  ;;  %v47_v6 = vadd.s32 24, %v44_v1  ;;  %s143_s11 = sshll.u32 %s238_s10, 4  ;;  %s184_s12 = scalar_lea.vmem %s131_s9, 512  ;;  %s278_s11 = int_to_ptr.vmem [resolvable:$true] %s143_s11 }
  0x19   :  { %s37_s5 = sshrl.u32 %s36_s4, 15  ;;  %p185_p8 = scmp.ne.s32.totalorder %s131_s9, %s184_s12 }
  0x1a   :  { %s38_s6 = sxor.u32 %s37_s5, %s36_s4  ;;  %v49_v7 = vmul.u32 128, %v45_v4  ;;  %v50_v8 = vmul.u32 128, %v46_v5  ;;  %v54_v10 = vadd.s32 %v53_v2, %v48_v3  ;;  %p189_p9 = scmp.lt.s32.totalorder %s131_s9, %s131_s9 }
  0x1b   :  { %s39_s1 = smul.u32 2221713035, %s38_s6  ;;  %v51_v9 = vmul.u32 128, %v47_v6  ;;  %p190_p10 = scmp.lt.s32.totalorder %s184_s12, %s184_s12 }
  0x1c   :  { %v55_v11 = vadd.s32 %v53_v2, %v49_v7  ;;  %v56_v12 = vadd.s32 %v53_v2, %v50_v8 }
  0x1d   :  { %s40_s0 = sshrl.u32 %s39_s1, 16  ;;  %v57_v13 = vadd.s32 %v53_v2, %v51_v9  ;;  %p191_p11 = por %p190_p10, %p189_p9 }
  0x1e   :  { %s41_s7 = sxor.u32 %s40_s0, %s39_s1 }
  0x1f   :  { %v63_v14 = vstv %s41_s7  ;;  %p192_p12 = pnand %p191_p11, %p185_p8 }
  0x20   :  { %v64_v15 = vxor.u32 %v63_v14, %v54_v10  ;;  %v65_v16 = vxor.u32 %v63_v14, %v55_v11  ;;  %v66_v17 = vxor.u32 %v63_v14, %v56_v12  ;;  %v67_v18 = vxor.u32 %v63_v14, %v57_v13 }
  0x22   :  { %v68_v19 = vshrl.u32 %v64_v15, 16  ;;  %v69_v20 = vshrl.u32 %v65_v16, 16  ;;  %v70_v21 = vshrl.u32 %v66_v17, 16  ;;  %v71_v22 = vshrl.u32 %v67_v18, 16 }
  0x24   :  { %v72_v23 = vxor.u32 %v68_v19, %v64_v15  ;;  %v73_v24 = vxor.u32 %v69_v20, %v65_v16  ;;  %v74_v25 = vxor.u32 %v70_v21, %v66_v17  ;;  %v75_v26 = vxor.u32 %v71_v22, %v67_v18 }
  0x26   :  { %v76_v27 = vmul.u32 2146121005, %v72_v23  ;;  %v77_v28 = vmul.u32 2146121005, %v73_v24 }
  0x27   :  { %v78_v29 = vmul.u32 2146121005, %v74_v25  ;;  %v79_v30 = vmul.u32 2146121005, %v75_v26 }
  0x28   :  { %v80_v31 = vshrl.u32 %v76_v27, 15  ;;  %v81_v32 = vshrl.u32 %v77_v28, 15 }
  0x29   :  { %v82_v33 = vshrl.u32 %v78_v29, 15  ;;  %v83_v34 = vshrl.u32 %v79_v30, 15 }
  0x2a   :  { %v84_v35 = vxor.u32 %v80_v31, %v76_v27  ;;  %v85_v36 = vxor.u32 %v81_v32, %v77_v28 }
  0x2b   :  { %v86_v37 = vxor.u32 %v82_v33, %v78_v29  ;;  %v87_v38 = vxor.u32 %v83_v34, %v79_v30 }
  0x2c   :  { %v88_v39 = vmul.u32 2221713035, %v84_v35  ;;  %v89_v41 = vmul.u32 2221713035, %v85_v36 }
  0x2d   :  { %v90_v43 = vmul.u32 2221713035, %v86_v37  ;;  %v91_v45 = vmul.u32 2221713035, %v87_v38 }
  0x2e   :  { %v92_v47 = vshrl.u32 %v88_v39, 16  ;;  %v93_v48 = vshrl.u32 %v89_v41, 16 }
  0x2f   :  { %v94_v51 = vshrl.u32 %v90_v43, 16  ;;  %v95_v52 = vshrl.u32 %v91_v45, 16 }
  0x30   :  { %v96_v53 = vxor.u32 %v92_v47, %v88_v39  ;;  %v97_v54 = vxor.u32 %v93_v48, %v89_v41 }
  0x31   :  { %v98_v57 = vxor.u32 %v94_v51, %v90_v43  ;;  %v99_v58 = vxor.u32 %v95_v52, %v91_v45 }
  0x32   :  { %vm100_vm0 = vcmp.lt.u32.totalorder %v96_v53, 2147483648  ;;  %vm101_vm1 = vcmp.lt.u32.totalorder %v97_v54, 2147483648 }
  0x33   :  { %v112_v59 = vsel %vm100_vm0, %v108_v49, 0.0  ;;  %v113_v60 = vsel %vm101_vm1, %v109_v50, 0.0  ;;  %vm102_vm2 = vcmp.lt.u32.totalorder %v98_v57, 2147483648  ;;  %vm103_vm3 = vcmp.lt.u32.totalorder %v99_v58, 2147483648  ;;  %vm120_vm4 = vmpackc.low %vm101_vm1, %vm100_vm0 }
  0x34   :  { %116 = vst [vmem:[#allocation6] sm:$0xff] %v112_v59  ;;  %117 = vst [vmem:[#allocation6 + $0x8] sm:$0xff] %v113_v60  ;;  %v114_v61 = vsel %vm102_vm2, %v110_v55, 0.0  ;;  %v115_v62 = vsel %vm103_vm3, %v111_v56, 0.0 }
  0x35   :  { %vm121_vm5 = vmpackc.low %vm103_vm3, %vm102_vm2  ;;  %118 = vst [vmem:[#allocation6 + $0x10] sm:$0xff] %v114_v61 }
  0x36   :  { %119 = vst [vmem:[#allocation6 + $0x18] sm:$0xff] %v115_v62  ;;  %vm122_vm6 = vmpackc.even %vm121_vm5, %vm120_vm4 }
  0x37   :  { %v123_v0 = vsel %vm122_vm6, 16843009, %v239_v63 }
  0x38   :  { %195 = shalt.err (!%p192_p12)
}
  0x39   :  { %s196_s15 = scalar_lea.hbm %s314_s2, 512 }
  0x3a   :  { %p197_p13 = scmp.ne.s32.totalorder %s314_s2, %s196_s15  ;;  %p200_p0 = scmp.lt.u32.totalorder %s196_s15, %s314_s2 }
  0x3c   :  { %p202_p1 = pnand %p200_p0, %p197_p13 }
  0x3e   :  { %205 = shalt.err (!%p202_p1)
}
  0x3f   :  { %136 = dma.vmem_to_hbm [thread:$0]  %s131_s9, 512, %s314_s2, [#allocation5], %s235_s22, %s235_s22, %s236_s23   ;;  %124 = vst [vmem:[#allocation7] sm:$0xff] %v123_v0 }
  0x40   :  { %s206_s24 = scalar_lea.vmem %s278_s11, 128  ;;  %p211_p3 = scmp.lt.s32.totalorder %s278_s11, %s278_s11 }
  0x41   :  { %p207_p2 = scmp.ne.s32.totalorder %s278_s11, %s206_s24  ;;  %p212_p4 = scmp.lt.s32.totalorder %s206_s24, %s206_s24 }
  0x43   :  { %p213_p5 = por %p212_p4, %p211_p3 }
  0x45   :  { %p214_p6 = pnand %p213_p5, %p207_p2 }
  0x47   :  { %217 = shalt.err (!%p214_p6)
}
  0x48   :  { %s218_s27 = scalar_lea.hbm %s315_s3, 128 }
  0x49   :  { %p219_p7 = scmp.ne.s32.totalorder %s315_s3, %s218_s27  ;;  %p222_p8 = scmp.lt.u32.totalorder %s218_s27, %s315_s3 }
  0x4b   :  { %p224_p9 = pnand %p222_p8, %p219_p7 }
  0x4d   :  { %227 = shalt.err (!%p224_p9)
}
  0x4e   :  { %146 = dma.vmem_to_hbm [thread:$0]  %s278_s11, 128, %s315_s3, [#allocation8]  }
  0x4f   :  { %230 = dma.done.wait [#allocation5], 512  }
  0x50   :  { %231 = vsyncadd [#allocation5], 4294966784 }
  0x51   :  { %232 = dma.done.wait [#allocation8], 128  }
  0x52   :  { %233 = vsyncadd [#allocation8], 4294967168 }
  0x53   :  { %153 = vsyncpa [#allocation4], 1 }
  0x54   :  { %154 = vsyncpa [#allocation5], 1 }
  0x55   :  { %155 = vsyncpa [#allocation8], 1 }

</bundles_post_ra>
